<compile_context>
chip_gen: v7x
topology: tpu7x:2x2x1
jax: 0.10.0
libtpu: 0.0.40
codegen_flags: <defaults>
</compile_context>

<pallas_src>
import jax
import jax.numpy as jnp
from jax.experimental import pallas as pl
from jax.experimental.pallas import tpu as pltpu


_LANE = 128                      # lane width: last block dim must divide by this
_SUBLANE = 8                     # sublane granularity for the row dim
_TARGET_TILE_ELEMS = 512 * 1024  # ~2 MiB per f32 buffer per tile
_XLA_FAST_PATH_ELEMS = 16 * 1024 # below this a fused XLA elementwise op wins


def _round_up(x: int, m: int) -> int:
    return ((x + m - 1) // m) * m


def _sampling_kernel(z_mean_ref, z_logvar_ref, eps_ref, out_ref):
    # Upcast on vregs (free VPU cast), exp on EUP, FMA on VPU, cast on store.
    zm = z_mean_ref[...].astype(jnp.float32)
    zl = z_logvar_ref[...].astype(jnp.float32)
    eps = eps_ref[...].astype(jnp.float32)
    out_ref[...] = (zm + jnp.exp(0.5 * zl) * eps).astype(out_ref.dtype)


def _pick_tile_rows(rows: int, cols: int) -> int:
    """Rows per tile: multiple of 8, ~_TARGET_TILE_ELEMS elems per tile, and
    grid >= 2 whenever there is enough work (v7x megacore + DMA pipelining)."""
    tile = max(_SUBLANE, (_TARGET_TILE_ELEMS // cols) // _SUBLANE * _SUBLANE)
    tile = min(tile, _round_up(rows, _SUBLANE))
    if rows > _SUBLANE and _round_up(rows, tile) // tile < 2:
        tile = max(_SUBLANE, _round_up(pl.cdiv(rows, 2), _SUBLANE))
    return tile


def _pallas_sampling_2d(z_mean, z_logvar, eps, out_dtype, tile_rows):
    rows, cols = z_mean.shape
    grid = rows // tile_rows
    block = pl.BlockSpec((tile_rows, cols), lambda i: (i, 0))
    return pl.pallas_call(
        _sampling_kernel,
        out_shape=jax.ShapeDtypeStruct((rows, cols), out_dtype),
        grid=(grid,),
        in_specs=[block, block, block],
        out_specs=block,
        compiler_params=pltpu.CompilerParams(
            dimension_semantics=("parallel",),
            vmem_limit_bytes=32 * 1024 * 1024,
        ),
    )(z_mean, z_logvar, eps)


@jax.jit
def sampling(z_mean: jax.Array, z_logvar: jax.Array, key: jax.Array) -> jax.Array:
    """VAE sampling layer.  z_mean, z_logvar: (batch, dim)."""
    assert z_mean.shape == z_logvar.shape and z_mean.ndim == 2
    b, d = z_mean.shape
    n = b * d
    out_dtype = z_mean.dtype

    # Tiny latents: pallas_call fixed overhead dominates -> fused XLA op.
    if n < _XLA_FAST_PATH_ELEMS:
        eps = jax.random.normal(key, (b, d), dtype=jnp.float32)
        z = z_mean.astype(jnp.float32) + jnp.exp(
            0.5 * z_logvar.astype(jnp.float32)) * eps
        return z.astype(out_dtype)

    if d % _LANE == 0:
        # Natural (batch, dim) layout: no flatten/pad/slice passes on inputs.
        tile_rows = _pick_tile_rows(b, d)
        rows = _round_up(b, tile_rows)
        eps = jax.random.normal(key, (rows, d), dtype=out_dtype)
        if rows != b:
            pad = ((0, rows - b), (0, 0))
            zm, zl = jnp.pad(z_mean, pad), jnp.pad(z_logvar, pad)
        else:
            zm, zl = z_mean, z_logvar
        out = _pallas_sampling_2d(zm, zl, eps, out_dtype, tile_rows)
        return out if rows == b else out[:b]

    # Misaligned last dim: flatten into a lane-dense slab (tail pad only).
    cols = 512 if n >= 65536 else _LANE
    rows_needed = pl.cdiv(n, cols)
    tile_rows = _pick_tile_rows(rows_needed, cols)
    rows = _round_up(rows_needed, tile_rows)
    padded = rows * cols

    def to_slab(x):
        flat = x.reshape(-1)
        return jnp.pad(flat, (0, padded - n)).reshape(rows, cols)

    # Epsilon is drawn directly at the slab shape -> never needs padding.
    eps = jax.random.normal(key, (rows, cols), dtype=out_dtype)
    out = _pallas_sampling_2d(to_slab(z_mean), to_slab(z_logvar), eps,
                              out_dtype, tile_rows)
    return out.reshape(-1)[:n].reshape(b, d)


if __name__ == "__main__":
    key = jax.random.PRNGKey(0)
    k_mean, k_logvar, k_eps = jax.random.split(key, 3)

    # 1) Lane-aligned latents -> natural-layout Pallas path, multi-tile grid.
    b, d = 256, 512
    z_mean = jax.random.normal(k_mean, (b, d), dtype=jnp.float32)
    z_logvar = 0.1 * jax.random.normal(k_logvar, (b, d), dtype=jnp.float32)
    z = sampling(z_mean, z_logvar, k_eps)
    jax.block_until_ready(z)
    assert z.shape == (b, d)
    assert z.dtype == z_mean.dtype
    # Exact reference: epsilon is drawn in the wrapper from the same key/shape.
    eps_ref = jax.random.normal(k_eps, (b, d), dtype=jnp.float32)
    z_ref = z_mean + jnp.exp(0.5 * z_logvar) * eps_ref
    assert bool(jnp.allclose(z, z_ref, atol=1e-4, rtol=1e-4))

    # 2) Module-scale tiny latent (2, 32) -> fused XLA fast path.
    zm_s = jax.random.normal(jax.random.PRNGKey(1), (2, 32), dtype=jnp.float32)
    zl_s = jax.random.normal(jax.random.PRNGKey(2), (2, 32), dtype=jnp.float32)
    z_s = sampling(zm_s, zl_s, jax.random.PRNGKey(3))
    jax.block_until_ready(z_s)
    assert z_s.shape == (2, 32)
    assert bool(jnp.all(jnp.isfinite(z_s)))

    # 3) Misaligned last dim -> slab Pallas path; check implied eps ~ N(0, 1).
    zm_m = jax.random.normal(jax.random.PRNGKey(4), (64, 300), dtype=jnp.float32)
    zl_m = 0.1 * jax.random.normal(jax.random.PRNGKey(5), (64, 300), dtype=jnp.float32)
    z_m = sampling(zm_m, zl_m, jax.random.PRNGKey(6))
    jax.block_until_ready(z_m)
    assert z_m.shape == (64, 300)
    eps_m = ((z_m - zm_m) / jnp.exp(0.5 * zl_m)).reshape(-1)
    assert abs(float(jnp.mean(eps_m))) < 0.05
    assert abs(float(jnp.std(eps_m)) - 1.0) < 0.05

    print("KERNEL_OK")
</pallas_src>

<mosaic_0001>
module attributes {stable_mosaic.version = 11 : i64} {
  func.func @_sampling_kernel(%arg0: i32, %arg1: memref<128x512xf32, #tpu.memory_space<vmem>>, %arg2: memref<128x512xf32, #tpu.memory_space<vmem>>, %arg3: memref<128x512xf32, #tpu.memory_space<vmem>>, %arg4: memref<128x512xf32, #tpu.memory_space<vmem>>) attributes {dimension_semantics = [#tpu.dimension_semantics<parallel>], iteration_bounds = array<i64: 2>, scalar_prefetch = 0 : i64, scratch_operands = 0 : i64, tpu.core_type = #tpu.core_type<tc>, window_params = [{transform_indices = @transform_0, window_bounds = array<i64: 128, 512>}, {transform_indices = @transform_1, window_bounds = array<i64: 128, 512>}, {transform_indices = @transform_2, window_bounds = array<i64: 128, 512>}, {transform_indices = @transform_3, window_bounds = array<i64: 128, 512>}]} {
    %c0 = arith.constant 0 : index
    %c0_0 = arith.constant 0 : index
    %0 = vector.load %arg1[%c0, %c0_0] : memref<128x512xf32, #tpu.memory_space<vmem>>, vector<128x512xf32>
    %c0_1 = arith.constant 0 : index
    %c0_2 = arith.constant 0 : index
    %1 = vector.load %arg2[%c0_1, %c0_2] : memref<128x512xf32, #tpu.memory_space<vmem>>, vector<128x512xf32>
    %c0_3 = arith.constant 0 : index
    %c0_4 = arith.constant 0 : index
    %2 = vector.load %arg3[%c0_3, %c0_4] : memref<128x512xf32, #tpu.memory_space<vmem>>, vector<128x512xf32>
    %cst = arith.constant 5.000000e-01 : f32
    %3 = vector.broadcast %cst : f32 to vector<128x512xf32>
    %4 = arith.mulf %3, %1 : vector<128x512xf32>
    %5 = math.exp %4 : vector<128x512xf32>
    %6 = arith.mulf %5, %2 : vector<128x512xf32>
    %7 = arith.addf %0, %6 : vector<128x512xf32>
    %c0_5 = arith.constant 0 : index
    %c0_6 = arith.constant 0 : index
    %8 = vector.load %arg4[%c0_5, %c0_6] : memref<128x512xf32, #tpu.memory_space<vmem>>, vector<128x512xf32>
    tpu.vector_store %arg4[%c0_5, %c0_6], %7 {strides = array<i32>} : memref<128x512xf32, #tpu.memory_space<vmem>>, vector<128x512xf32>,
    return
  }
  func.func @transform_0(%arg0: i32) -> (i32, i32) {
    %c0_i32 = arith.constant 0 : i32
    %c0_i32_0 = arith.constant 0 : i32
    return %arg0, %c0_i32 : i32, i32
  }
  func.func @transform_1(%arg0: i32) -> (i32, i32) {
    %c0_i32 = arith.constant 0 : i32
    %c0_i32_0 = arith.constant 0 : i32
    return %arg0, %c0_i32 : i32, i32
  }
  func.func @transform_2(%arg0: i32) -> (i32, i32) {
    %c0_i32 = arith.constant 0 : i32
    %c0_i32_0 = arith.constant 0 : i32
    return %arg0, %c0_i32 : i32, i32
  }
  func.func @transform_3(%arg0: i32) -> (i32, i32) {
    %c0_i32 = arith.constant 0 : i32
    %c0_i32_0 = arith.constant 0 : i32
    return %arg0, %c0_i32 : i32, i32
  }
}

</mosaic_0001>

<bundles_post_ra>
// kernel: sampling.1
= control target key start
LH: loop header
LB: loop body
LE: loop exit
PB: predicated region body
PF: predicated region fallthrough
CT: control target
= control target key end

     0   :  { %8 = vsyncpa [#allocation3], 0  ;;  %s1701_s0 = inlined_call_operand.vmem [shape: f32[256,512], index: 0, kind: input, shape index: {}]   ;;  %s1702_s1 = inlined_call_operand.hbm [shape: f32[256,512], index: 1, kind: input, shape index: {}]   ;;  %s1703_s2 = inlined_call_operand.vmem [shape: f32[256,512], index: 2, kind: input, shape index: {}]   ;;  %s1704_s3 = inlined_call_operand.hbm [shape: f32[256,512], index: 3, kind: output, shape index: {}]  }
   0x1   :  { %10 = vsyncpa [#allocation3 + $0x1], 0 }
   0x2   :  { %11 = vsyncpa [#allocation4], 0 }
   0x3   :  { %13 = vsyncpa [#allocation4 + $0x1], 0  ;;  %s1260_s12 = smov 0   ;;  %s1262_s13 = smov 0  }
   0x4   :  { %s1264_s14 = smov 0   ;;  %s1266_s15 = smov 0  }
   0x5 LB: > { %s1281_s16 = sadd.s32 4294967295, %s1232_s15   ;;  %s930_s17 = sadd.s32 4294967294, %s1232_s15   ;;  %s1232_s15 = sphi %s1266_s15, %s1717_s15   ;;  %s1228_s14 = sphi %s1264_s14, %s1716_s14   ;;  %s1224_s13 = sphi %s1262_s13, %s1715_s13   ;;  %s1220_s12 = sphi %s1260_s12, %s1714_s12  }
   0x6   : > { %s1285_s18 = sadd.s32 1, %s1232_s15   ;;  %s52_s19 = sadd.s32 1, %s1228_s14 }
   0x7   : > { %s49_s20 = ssub.s32 %s1232_s15, %s1285_s18  ;;  %p59_p0 = scmp.ne.s32.totalorder %s1228_s14, %s1224_s13 }
   0x8   : > { %p50_p1 = scmp.eq.s32.totalorder %s49_s20, 0  ;;  %p60_p2 = scmp.eq.s32.totalorder %s1232_s15, 0 }
   0x9   : > { %p65_p3 = scmp.ne.s32.totalorder %s1224_s13, %s1220_s12  ;;  %p66_p4 = scmp.eq.s32.totalorder %s1281_s16, 0 }
   0xa   : > { %s1297_s21 = scalar_select %p50_p1, %s1228_s14, %s52_s19  }
   0xb   : > { %p1299_p5 = por %p60_p2, %p59_p0  ;;  %p1303_p6 = por %p66_p4, %p65_p3 }
   0xc   : > { %p115_p7 = scmp.eq.s32.totalorder %s1281_s16, 1  ;;  %p121_p8 = scmp.eq.s32.totalorder %s930_s17, 1 }
   0xd   : > { %p970_p10 = scmp.lt.s32.totalorder %s1232_s15, 2  ;;  %s151_s26 = sand.u32 1, %s1228_s14  }
   0xe   : > { %p1310_p11 = por %p115_p7, %p59_p0  ;;  %p1314_p12 = por %p121_p8, %p65_p3 }
   0xf   : > { %s953_s27 = sshll.u32 %s1232_s15, 13  ;;  %s933_s28 = sshll.u32 %s151_s26, 9 }
  0x10   : > { %s1708_s24 = scalar_select %p1310_p11, 1, 0 }
  0x11   : > { %s1709_s25 = scalar_select %p1314_p12, 1, 0 }
  0x12   : > { %s1323_s4 = scalar_lea.hbm %s1702_s1, %s953_s27  ;;  %s155_s5 = scalar_lea.vmem [#allocation2], %s933_s28 }
  0x13   : > { %s163_s6 = sshll.u32 %s155_s5, 4  ;;  %p1327_p13 = pnand %p970_p10, %p1299_p5  ;;  %s1331_s6 = int_to_ptr.vmem [resolvable:$true] %s163_s6 }
  0x14   : > { %s1333_s8 = scalar_lea.sflag [#allocation3], %s151_s26  ;;  %s1136_s9 = scalar_lea.hbm %s1323_s4, 8192 }
  0x15   : > { %p1137_p0 = scmp.ne.s32.totalorder %s1323_s4, %s1136_s9  ;;  %p1138_p1 = pneg %p1327_p13 }
  0x16   : > { %s1141_s17 = scalar_lea.hbm %s1702_s1, 16384  ;;  %p1142_p4 = scmp.lt.u32.totalorder %s1323_s4, %s1702_s1 }
  0x17   : > { %p1139_p2 = pnand %p1138_p1, %p1137_p0  ;;  %p1143_p5 = scmp.lt.u32.totalorder %s1141_s17, %s1136_s9 }
  0x18   : > { %p1145_p8 = scmp.lt.u32.totalorder %s1136_s9, %s1323_s4 }
  0x19   : > { %p1140_p3 = pneg %p1139_p2  ;;  %p1144_p7 = por %p1143_p5, %p1142_p4 }
  0x1b   : > { %p1146_p10 = por %p1145_p8, %p1144_p7 }
  0x1d   : > { %p1147_p9 = pnand %p1146_p10, %p1140_p3 }
  0x1f   : > { %1150 = shalt.err (!%p1147_p9)
}
  0x20   : > { %s1151_s22 = scalar_lea.vmem %s1331_s6, 8192  ;;  %s1234_s26 = smov [#allocation2]  }
  0x21   : > { %p1152_p0 = scmp.ne.s32.totalorder %s1331_s6, %s1151_s22  ;;  %s1156_s27 = sshll.u32 %s1234_s26, 4  ;;  %s1157_s27 = int_to_ptr.vmem [resolvable:$false] %s1156_s27 }
  0x22   : > { %s1158_s28 = scalar_lea.vmem %s1157_s27, 16384  ;;  %p1159_p11 = scmp.lt.s32.totalorder %s1331_s6, %s1157_s27 }
  0x23   : > { %p1154_p2 = pnand %p1152_p0, %p1138_p1  ;;  %p1160_p4 = scmp.lt.s32.totalorder %s1158_s28, %s1151_s22 }
  0x25   : > { %p1155_p12 = pneg %p1154_p2  ;;  %p1161_p5 = por %p1160_p4, %p1159_p11 }
  0x27   : > { %p1162_p7 = pnand %p1161_p5, %p1155_p12 }
  0x29   : > { %1165 = shalt.err (!%p1162_p7)
}
  0x2a   : > { %s1235_s29 = smov 512   ;;  %s1236_s30 = smov 32  }
  0x2b   : > { %965 = dma.hbm_to_vmem [thread:$0]  (!%p1327_p13), %s1323_s4, 8192, %s1331_s6, %s1333_s8, %s1235_s29, %s1235_s29, %s1236_s30  }
  0x2c   : > { %p937_p9 = scmp.ge.s32.totalorder %s1232_s15, 1  ;;  %p181_p1 = scmp.lt.s32.totalorder %s1232_s15, 3 }
  0x2e   : > { %p182_p3 = pnand %p937_p9, %p181_p1 }
  0x2f   : > { %s1364_s5 = sand.u32 (!%p182_p3), 1, %s1224_s13  }
  0x30   : > { %185 = sbr.rel (%p182_p3) target bundleno = 166 (0xa6), region = 32  ;;  %s938_s9 = sshll.u32 (!%p182_p3), %s1364_s5, 9 }
  0x31   : > { %s188_s10 = scalar_lea.sflag (!%p182_p3), [#allocation3], %s1364_s5  ;;  %s1370_s11 = scalar_lea.vmem (!%p182_p3), [#allocation2], %s938_s9 }
  0x37   : > { %1211 = dma.done.wait (%p1303_p6), %s188_s10, 8192  }
  0x38   : > { %1213 = vsyncadd (%p1303_p6), %s188_s10, 4294959104  ;;  %s940_s4 = sshll.u32 %s1281_s16, 4  ;;  %v306_v0 = vld [vmem:[%s1370_s11] sm:$0xff]  ;;  %v307_v2 = vld [vmem:[%s1370_s11 + $0x8] sm:$0xff]  ;;  %s1424_s22 = scalar_lea.vmem [#allocation5], %s938_s9 }
  0x39   : > { %p227_p11 = scmp.lt.s32.totalorder %s940_s4, 31  ;;  %v434_v1 = vmul.f32 0.5, %v306_v0  ;;  %v435_v3 = vmul.f32 0.5, %v307_v2  ;;  %v308_v4 = vld [vmem:[%s1370_s11 + $0x10] sm:$0xff]  ;;  %v309_v7 = vld [vmem:[%s1370_s11 + $0x18] sm:$0xff]  ;;  %v310_v10 = vld [vmem:[%s1370_s11 + $0x20] sm:$0xff] }
  0x3a   : > { %v436_v6 = vmul.f32 0.5, %v308_v4  ;;  %v437_v9 = vmul.f32 0.5, %v309_v7  ;;  %v438_v12 = vmul.f32 0.5, %v310_v10  ;;  %v311_v13 = vld [vmem:[%s1370_s11 + $0x28] sm:$0xff]  ;;  %v312_v16 = vld [vmem:[%s1370_s11 + $0x30] sm:$0xff]  ;;  %v313_v19 = vld [vmem:[%s1370_s11 + $0x38] sm:$0xff] }
  0x3b   : > { %s1719_s4 = smov (!%p227_p11, %s940_s4), 31  ;;  %v498_v5 = vmul.f32 1.442695, %v434_v1  ;;  %v500_v8 = vmul.f32 1.442695, %v435_v3  ;;  %v439_v15 = vmul.f32 0.5, %v311_v13 }
  0x3c   : > { %v502_v11 = vmul.f32 1.442695, %v436_v6  ;;  %v504_v14 = vmul.f32 1.442695, %v437_v9  ;;  %s954_s23 = sshll.u32 %s1719_s4, 5  ;;  %v440_v18 = vmul.f32 0.5, %v312_v16 }
  0x3d   : > { %1008 = vpow2.f32 %v498_v5  ;;  %v506_v17 = vmul.f32 1.442695, %v438_v12  ;;  %v508_v20 = vmul.f32 1.442695, %v439_v15  ;;  %v441_v21 = vmul.f32 0.5, %v313_v19  ;;  %v314_v22 = vld [vmem:[%s1370_s11 + $0x40] sm:$0xff]  ;;  %s1393_s8 = scalar_lea.vmem %s1703_s2, %s954_s23  ;;  %s1400_s20 = scalar_lea.vmem %s1701_s0, %s954_s23 }
  0x3e   : > { %1010 = vpow2.f32 %v500_v8  ;;  %v510_v23 = vmul.f32 1.442695, %v440_v18  ;;  %v442_v24 = vmul.f32 0.5, %v314_v22  ;;  %v315_v25 = vld [vmem:[%s1370_s11 + $0x48] sm:$0xff]  ;;  %v316_v28 = vld [vmem:[%s1370_s11 + $0x50] sm:$0xff]  ;;  %v317_v31 = vld [vmem:[%s1370_s11 + $0x58] sm:$0xff] }
  0x3f   : > { %1012 = vpow2.f32 %v502_v11  ;;  %v512_v26 = vmul.f32 1.442695, %v441_v21  ;;  %v443_v27 = vmul.f32 0.5, %v315_v25  ;;  %v444_v30 = vmul.f32 0.5, %v316_v28  ;;  %v318_v34 = vld [vmem:[%s1370_s11 + $0x60] sm:$0xff]  ;;  %v319_v38 = vld [vmem:[%s1370_s11 + $0x68] sm:$0xff] }
  0x40   : > { %1014 = vpow2.f32 %v504_v14  ;;  %v514_v29 = vmul.f32 1.442695, %v442_v24  ;;  %v445_v33 = vmul.f32 0.5, %v317_v31  ;;  %v370_v35 = vld [vmem:[%s1393_s8] sm:$0xff]  ;;  %v446_v37 = vmul.f32 0.5, %v318_v34  ;;  %v371_v39 = vld [vmem:[%s1393_s8 + $0x8] sm:$0xff] }
  0x41   : > { %1016 = vpow2.f32 %v506_v17  ;;  %v516_v32 = vmul.f32 1.442695, %v443_v27  ;;  %v518_v36 = vmul.f32 1.442695, %v444_v30  ;;  %v447_v41 = vmul.f32 0.5, %v319_v38  ;;  %v320_v42 = vld [vmem:[%s1370_s11 + $0x70] sm:$0xff] }
  0x42   : > { %1018 = vpow2.f32 %v508_v20  ;;  %v520_v40 = vmul.f32 1.442695, %v445_v33  ;;  %v242_v44 = vld [vmem:[%s1400_s20] sm:$0xff]  ;;  %v372_v45 = vld [vmem:[%s1393_s8 + $0x10] sm:$0xff]  ;;  %v522_v46 = vmul.f32 1.442695, %v446_v37 }
  0x43   : > { %1020 = vpow2.f32 %v510_v23  ;;  %v448_v47 = vmul.f32 0.5, %v320_v42  ;;  %v321_v48 = vld [vmem:[%s1370_s11 + $0x78] sm:$0xff]  ;;  %v243_v51 = vld [vmem:[%s1400_s20 + $0x8] sm:$0xff]  ;;  %v524_v53 = vmul.f32 1.442695, %v447_v41  ;;  %v322_v55 = vld [vmem:[%s1370_s11 + $0x80] sm:$0xff] }
  0x44   : > { %1022 = vpow2.f32 %v512_v26  ;;  %v373_v52 = vld [vmem:[%s1393_s8 + $0x18] sm:$0xff]  ;;  %v449_v54 = vmul.f32 0.5, %v321_v48  ;;  %v244_v58 = vld [vmem:[%s1400_s20 + $0x10] sm:$0xff]  ;;  %v374_v59 = vld [vmem:[%s1393_s8 + $0x20] sm:$0xff]  ;;  %v450_v61 = vmul.f32 0.5, %v322_v55  ;;  %s957_s26 = sshll.u32 %s1281_s16, 13 }
  0x45   : > { %1024 = vpow2.f32 %v514_v29  ;;  %v526_v60 = vmul.f32 1.442695, %v448_v47  ;;  %v323_v62 = vld [vmem:[%s1370_s11 + $0x88] sm:$0xff]  ;;  %v245_v2 = vld [vmem:[%s1400_s20 + $0x18] sm:$0xff]  ;;  %v324_v5 = vld [vmem:[%s1370_s11 + $0x90] sm:$0xff]  ;;  %s833_s27 = sshll.u32 %s1424_s22, 4  ;;  %s1653_s30 = scalar_lea.hbm %s1704_s3, %s957_s26  ;;  %s1655_s27 = int_to_ptr.vmem [resolvable:$true] %s833_s27 }
  0x46   : > { %1026 = vpow2.f32 %v516_v32  ;;  %v375_v3 = vld [vmem:[%s1393_s8 + $0x28] sm:$0xff]  ;;  %v528_v4 = vmul.f32 1.442695, %v449_v54  ;;  %v246_v9 = vld [vmem:[%s1400_s20 + $0x20] sm:$0xff]  ;;  %v376_v10 = vld [vmem:[%s1393_s8 + $0x30] sm:$0xff]  ;;  %v451_v18 = vmul.f32 0.5, %v323_v62 }
  0x47   : > { %v1009_v43 = vpop.eup %1008  ;;  %1028 = vpow2.f32 %v518_v36  ;;  %v530_v11 = vmul.f32 1.442695, %v450_v61  ;;  %v325_v12 = vld [vmem:[%s1370_s11 + $0x98] sm:$0xff]  ;;  %v247_v16 = vld [vmem:[%s1400_s20 + $0x28] sm:$0xff]  ;;  %v326_v19 = vld [vmem:[%s1370_s11 + $0xa0] sm:$0xff]  ;;  %v452_v25 = vmul.f32 0.5, %v324_v5 }
  0x48   : > { %v1011_v49 = vpop.eup %1010  ;;  %v626_v50 = vmul.f32 %v1009_v43, %v370_v35  ;;  %1030 = vpow2.f32 %v520_v40  ;;  %v377_v17 = vld [vmem:[%s1393_s8 + $0x38] sm:$0xff]  ;;  %v248_v23 = vld [vmem:[%s1400_s20 + $0x30] sm:$0xff]  ;;  %v378_v24 = vld [vmem:[%s1393_s8 + $0x40] sm:$0xff]  ;;  %v532_v31 = vmul.f32 1.442695, %v451_v18  ;;  %v453_v32 = vmul.f32 0.5, %v325_v12 }
  0x49   : > { %v1013_v56 = vpop.eup %1012  ;;  %v627_v57 = vmul.f32 %v1011_v49, %v371_v39  ;;  %1032 = vpow2.f32 %v522_v46  ;;  %v249_v29 = vld [vmem:[%s1400_s20 + $0x38] sm:$0xff]  ;;  %v379_v30 = vld [vmem:[%s1393_s8 + $0x48] sm:$0xff]  ;;  %v250_v36 = vld [vmem:[%s1400_s20 + $0x40] sm:$0xff]  ;;  %v534_v38 = vmul.f32 1.442695, %v452_v25  ;;  %v454_v39 = vmul.f32 0.5, %v326_v19 }
  0x4a   : > { %v1015_v63 = vpop.eup %1014  ;;  %v690_v0 = vadd.f32 %v626_v50, %v242_v44  ;;  %v628_v1 = vmul.f32 %v1013_v56, %v372_v45  ;;  %1034 = vpow2.f32 %v524_v53  ;;  %v380_v37 = vld [vmem:[%s1393_s8 + $0x50] sm:$0xff]  ;;  %v327_v40 = vld [vmem:[%s1370_s11 + $0xa8] sm:$0xff]  ;;  %v381_v45 = vld [vmem:[%s1393_s8 + $0x58] sm:$0xff]  ;;  %v536_v46 = vmul.f32 1.442695, %v453_v32  ;;  %s819_s16 = scalar_lea.sflag [#allocation4], %s1364_s5 }
  0x4b   : > { %v1017_v6 = vpop.eup %1016  ;;  %v691_v7 = vadd.f32 %v627_v57, %v243_v51  ;;  %v629_v8 = vmul.f32 %v1015_v63, %v373_v52  ;;  %1036 = vpow2.f32 %v526_v60  ;;  %v251_v44 = vld [vmem:[%s1400_s20 + $0x48] sm:$0xff]  ;;  %v328_v47 = vld [vmem:[%s1370_s11 + $0xb0] sm:$0xff]  ;;  %v382_v52 = vld [vmem:[%s1393_s8 + $0x60] sm:$0xff]  ;;  %v538_v53 = vmul.f32 1.442695, %v454_v39  ;;  %s1166_s9 = scalar_lea.vmem %s1655_s27, 8192 }
  0x4c   : > { %v1019_v13 = vpop.eup %1018  ;;  %754 = vst [vmem:[%s1424_s22] sm:$0xff] %v690_v0  ;;  %v692_v14 = vadd.f32 %v628_v1, %v244_v58  ;;  %v630_v15 = vmul.f32 %v1017_v6, %v374_v59  ;;  %1038 = vpow2.f32 %v528_v4  ;;  %v252_v51 = vld [vmem:[%s1400_s20 + $0x50] sm:$0xff]  ;;  %v329_v54 = vld [vmem:[%s1370_s11 + $0xb8] sm:$0xff]  ;;  %v383_v59 = vld [vmem:[%s1393_s8 + $0x68] sm:$0xff]  ;;  %v455_v60 = vmul.f32 0.5, %v327_v40  ;;  %p1167_p6 = scmp.ne.s32.totalorder %s1655_s27, %s1166_s9  ;;  %p1711_p12 = scmp.ne.s32.totalorder %s1708_s24, 0 }
  0x4d   : > { %v1021_v20 = vpop.eup %1020  ;;  %755 = vst [vmem:[%s1424_s22 + $0x8] sm:$0xff] %v691_v7  ;;  %v693_v21 = vadd.f32 %v629_v8, %v245_v2  ;;  %v631_v22 = vmul.f32 %v1019_v13, %v375_v3  ;;  %1040 = vpow2.f32 %v530_v11  ;;  %v253_v58 = vld [vmem:[%s1400_s20 + $0x58] sm:$0xff]  ;;  %v330_v61 = vld [vmem:[%s1370_s11 + $0xc0] sm:$0xff]  ;;  %v384_v2 = vld [vmem:[%s1393_s8 + $0x70] sm:$0xff]  ;;  %v456_v3 = vmul.f32 0.5, %v328_v47  ;;  %s1237_s10 = smov [#allocation5]  }
  0x4e   : > { %v1023_v26 = vpop.eup %1022  ;;  %756 = vst [vmem:[%s1424_s22 + $0x10] sm:$0xff] %v692_v14  ;;  %v694_v27 = vadd.f32 %v630_v15, %v246_v9  ;;  %v632_v28 = vmul.f32 %v1021_v20, %v376_v10  ;;  %1042 = vpow2.f32 %v532_v31  ;;  %v254_v1 = vld [vmem:[%s1400_s20 + $0x60] sm:$0xff]  ;;  %v255_v7 = vld [vmem:[%s1400_s20 + $0x68] sm:$0xff]  ;;  %v385_v8 = vld [vmem:[%s1393_s8 + $0x78] sm:$0xff]  ;;  %v540_v9 = vmul.f32 1.442695, %v455_v60  ;;  %p1168_p13 = pnand %p1167_p6, %p1711_p12 }
  0x4f   : > { %v1025_v33 = vpop.eup %1024  ;;  %757 = vst [vmem:[%s1424_s22 + $0x18] sm:$0xff] %v693_v21  ;;  %v695_v34 = vadd.f32 %v631_v22, %v247_v16  ;;  %v633_v35 = vmul.f32 %v1023_v26, %v377_v17  ;;  %1044 = vpow2.f32 %v534_v38  ;;  %v457_v10 = vmul.f32 0.5, %v329_v54  ;;  %v256_v14 = vld [vmem:[%s1400_s20 + $0x70] sm:$0xff]  ;;  %v386_v15 = vld [vmem:[%s1393_s8 + $0x80] sm:$0xff]  ;;  %v331_v18 = vld [vmem:[%s1370_s11 + $0xc8] sm:$0xff] }
  0x50   : > { %v1027_v41 = vpop.eup %1026  ;;  %758 = vst [vmem:[%s1424_s22 + $0x20] sm:$0xff] %v694_v27  ;;  %v696_v42 = vadd.f32 %v632_v28, %v248_v23  ;;  %v634_v43 = vmul.f32 %v1025_v33, %v378_v24  ;;  %1046 = vpow2.f32 %v536_v46  ;;  %v542_v16 = vmul.f32 1.442695, %v456_v3  ;;  %v257_v22 = vld [vmem:[%s1400_s20 + $0x78] sm:$0xff]  ;;  %v332_v24 = vld [vmem:[%s1370_s11 + $0xd0] sm:$0xff]  ;;  %v334_v31 = vld [vmem:[%s1370_s11 + $0xe0] sm:$0xff]  ;;  %p1169_p8 = pneg %p1168_p13 }
  0x51   : > { %v1029_v48 = vpop.eup %1028  ;;  %759 = vst [vmem:[%s1424_s22 + $0x28] sm:$0xff] %v695_v34  ;;  %v697_v49 = vadd.f32 %v633_v35, %v249_v29  ;;  %v635_v50 = vmul.f32 %v1027_v41, %v379_v30  ;;  %1048 = vpow2.f32 %v538_v53  ;;  %v458_v17 = vmul.f32 0.5, %v330_v61  ;;  %v333_v25 = vld [vmem:[%s1370_s11 + $0xd8] sm:$0xff]  ;;  %v258_v29 = vld [vmem:[%s1400_s20 + $0x80] sm:$0xff]  ;;  %v335_v32 = vld [vmem:[%s1370_s11 + $0xe8] sm:$0xff] }
  0x52   : > { %v1031_v55 = vpop.eup %1030  ;;  %760 = vst [vmem:[%s1424_s22 + $0x30] sm:$0xff] %v696_v42  ;;  %v698_v56 = vadd.f32 %v634_v43, %v250_v36  ;;  %v636_v57 = vmul.f32 %v1029_v48, %v380_v37  ;;  %1050 = vpow2.f32 %v540_v9  ;;  %v544_v23 = vmul.f32 1.442695, %v457_v10  ;;  %v387_v35 = vld [vmem:[%s1393_s8 + $0x88] sm:$0xff]  ;;  %v336_v37 = vld [vmem:[%s1370_s11 + $0xf0] sm:$0xff]  ;;  %v261_v46 = vld [vmem:[%s1400_s20 + $0x98] sm:$0xff] }
  0x53   : > { %v1033_v62 = vpop.eup %1032  ;;  %761 = vst [vmem:[%s1424_s22 + $0x38] sm:$0xff] %v697_v49  ;;  %v699_v63 = vadd.f32 %v635_v50, %v251_v44  ;;  %v637_v0 = vmul.f32 %v1031_v55, %v381_v45  ;;  %1052 = vpow2.f32 %v542_v16  ;;  %v546_v30 = vmul.f32 1.442695, %v458_v17  ;;  %v259_v39 = vld [vmem:[%s1400_s20 + $0x88] sm:$0xff]  ;;  %v260_v40 = vld [vmem:[%s1400_s20 + $0x90] sm:$0xff]  ;;  %v389_v47 = vld [vmem:[%s1393_s8 + $0x98] sm:$0xff] }
  0x54   : > { %v1035_v4 = vpop.eup %1034  ;;  %762 = vst [vmem:[%s1424_s22 + $0x40] sm:$0xff] %v698_v56  ;;  %v700_v5 = vadd.f32 %v636_v57, %v252_v51  ;;  %v638_v6 = vmul.f32 %v1033_v62, %v382_v52  ;;  %1054 = vpow2.f32 %v544_v23  ;;  %v459_v36 = vmul.f32 0.5, %v331_v18  ;;  %v388_v41 = vld [vmem:[%s1393_s8 + $0x90] sm:$0xff]  ;;  %v390_v48 = vld [vmem:[%s1393_s8 + $0xa0] sm:$0xff]  ;;  %v337_v57 = vld [vmem:[%s1370_s11 + $0xf8] sm:$0xff] }
  0x55   : > { %v1037_v11 = vpop.eup %1036  ;;  %763 = vst [vmem:[%s1424_s22 + $0x48] sm:$0xff] %v699_v63  ;;  %v701_v12 = vadd.f32 %v637_v0, %v253_v58  ;;  %v639_v13 = vmul.f32 %v1035_v4, %v383_v59  ;;  %1056 = vpow2.f32 %v546_v30  ;;  %v460_v42 = vmul.f32 0.5, %v332_v24  ;;  %v338_v62 = vld [vmem:[%s1370_s11 + $0x100] sm:$0xff]  ;;  %v339_v63 = vld [vmem:[%s1370_s11 + $0x108] sm:$0xff]  ;;  %v393_v18 = vld [vmem:[%s1393_s8 + $0xb8] sm:$0xff] }
  0x56   : > { %v1039_v19 = vpop.eup %1038  ;;  %764 = vst [vmem:[%s1424_s22 + $0x50] sm:$0xff] %v700_v5  ;;  %v702_v20 = vadd.f32 %v638_v6, %v254_v1  ;;  %v640_v21 = vmul.f32 %v1037_v11, %v384_v2  ;;  %v461_v43 = vmul.f32 0.5, %v333_v25  ;;  %v548_v49 = vmul.f32 1.442695, %v459_v36  ;;  %v262_v3 = vld [vmem:[%s1400_s20 + $0xa0] sm:$0xff]  ;;  %v340_v5 = vld [vmem:[%s1370_s11 + $0x110] sm:$0xff] }
  0x57   : > { %v1041_v26 = vpop.eup %1040  ;;  %765 = vst [vmem:[%s1424_s22 + $0x58] sm:$0xff] %v701_v12  ;;  %v703_v27 = vadd.f32 %v639_v13, %v255_v7  ;;  %v641_v28 = vmul.f32 %v1039_v19, %v385_v8  ;;  %v462_v50 = vmul.f32 0.5, %v334_v31  ;;  %v463_v51 = vmul.f32 0.5, %v335_v32  ;;  %v391_v8 = vld [vmem:[%s1393_s8 + $0xa8] sm:$0xff]  ;;  %v392_v11 = vld [vmem:[%s1393_s8 + $0xb0] sm:$0xff]  ;;  %v394_v25 = vld [vmem:[%s1393_s8 + $0xc0] sm:$0xff] }
  0x58   : > { %766 = vst [vmem:[%s1424_s22 + $0x60] sm:$0xff] %v702_v20  ;;  %v704_v33 = vadd.f32 %v640_v21, %v256_v14  ;;  %v642_v34 = vmul.f32 %v1041_v26, %v386_v15  ;;  %v1043_v44 = vpop.eup %1042  ;;  %v550_v54 = vmul.f32 1.442695, %v460_v42  ;;  %v552_v55 = vmul.f32 1.442695, %v461_v43  ;;  %v341_v14 = vld [vmem:[%s1370_s11 + $0x118] sm:$0xff] }
  0x59   : > { %767 = vst [vmem:[%s1424_s22 + $0x68] sm:$0xff] %v703_v27  ;;  %v705_v38 = vadd.f32 %v641_v28, %v257_v22  ;;  %v1045_v52 = vpop.eup %1044  ;;  %v643_v53 = vmul.f32 %v1043_v44, %v387_v35  ;;  %v464_v56 = vmul.f32 0.5, %v336_v37  ;;  %1058 = vpow2.f32 %v548_v49  ;;  %v263_v17 = vld [vmem:[%s1400_s20 + $0xa8] sm:$0xff]  ;;  %v342_v21 = vld [vmem:[%s1370_s11 + $0x120] sm:$0xff]  ;;  %v264_v24 = vld [vmem:[%s1400_s20 + $0xb0] sm:$0xff] }
  0x5a   : > { %768 = vst [vmem:[%s1424_s22 + $0x70] sm:$0xff] %v704_v33  ;;  %v706_v45 = vadd.f32 %v642_v34, %v258_v29  ;;  %v1047_v58 = vpop.eup %1046  ;;  %v644_v59 = vmul.f32 %v1045_v52, %v388_v41  ;;  %v554_v60 = vmul.f32 1.442695, %v462_v50  ;;  %v556_v61 = vmul.f32 1.442695, %v463_v51  ;;  %v265_v30 = vld [vmem:[%s1400_s20 + $0xb8] sm:$0xff] }
  0x5b   : > { %769 = vst [vmem:[%s1424_s22 + $0x78] sm:$0xff] %v705_v38  ;;  %v1049_v0 = vpop.eup %1048  ;;  %v707_v1 = vadd.f32 %v643_v53, %v259_v39  ;;  %v645_v2 = vmul.f32 %v1047_v58, %v389_v47  ;;  %1060 = vpow2.f32 %v550_v54  ;;  %v558_v4 = vmul.f32 1.442695, %v464_v56  ;;  %v343_v33 = vld [vmem:[%s1370_s11 + $0x128] sm:$0xff]  ;;  %v266_v37 = vld [vmem:[%s1400_s20 + $0xc0] sm:$0xff]  ;;  %v344_v39 = vld [vmem:[%s1370_s11 + $0x130] sm:$0xff] }
  0x5c   : > { %770 = vst [vmem:[%s1424_s22 + $0x80] sm:$0xff] %v706_v45  ;;  %v708_v6 = vadd.f32 %v644_v59, %v260_v40  ;;  %v646_v7 = vmul.f32 %v1049_v0, %v390_v48  ;;  %1062 = vpow2.f32 %v552_v55  ;;  %v465_v9 = vmul.f32 0.5, %v337_v57  ;;  %v1051_v15 = vpop.eup %1050  ;;  %v345_v40 = vld [vmem:[%s1370_s11 + $0x138] sm:$0xff]  ;;  %v395_v43 = vld [vmem:[%s1393_s8 + $0xc8] sm:$0xff]  ;;  %v346_v45 = vld [vmem:[%s1370_s11 + $0x140] sm:$0xff] }
  0x5d   : > { %771 = vst [vmem:[%s1424_s22 + $0x88] sm:$0xff] %v707_v1  ;;  %v709_v10 = vadd.f32 %v645_v2, %v261_v46  ;;  %1064 = vpow2.f32 %v554_v60  ;;  %v466_v12 = vmul.f32 0.5, %v338_v62  ;;  %v467_v13 = vmul.f32 0.5, %v339_v63  ;;  %v1053_v22 = vpop.eup %1052  ;;  %v396_v47 = vld [vmem:[%s1393_s8 + $0xd0] sm:$0xff]  ;;  %v347_v50 = vld [vmem:[%s1370_s11 + $0x148] sm:$0xff]  ;;  %v397_v55 = vld [vmem:[%s1393_s8 + $0xd8] sm:$0xff] }
  0x5e   : > { %772 = vst [vmem:[%s1424_s22 + $0x90] sm:$0xff] %v708_v6  ;;  %v710_v16 = vadd.f32 %v646_v7, %v262_v3  ;;  %1066 = vpow2.f32 %v556_v61  ;;  %v560_v19 = vmul.f32 1.442695, %v465_v9  ;;  %v468_v20 = vmul.f32 0.5, %v340_v5  ;;  %v1055_v28 = vpop.eup %1054  ;;  %v267_v53 = vld [vmem:[%s1400_s20 + $0xc8] sm:$0xff]  ;;  %v268_v54 = vld [vmem:[%s1400_s20 + $0xd0] sm:$0xff] }
  0x5f   : > { %773 = vst [vmem:[%s1424_s22 + $0x98] sm:$0xff] %v709_v10  ;;  %v647_v23 = vmul.f32 %v1051_v15, %v391_v8  ;;  %1068 = vpow2.f32 %v558_v4  ;;  %v562_v26 = vmul.f32 1.442695, %v466_v12  ;;  %v564_v27 = vmul.f32 1.442695, %v467_v13  ;;  %v1057_v34 = vpop.eup %1056  ;;  %v269_v60 = vld [vmem:[%s1400_s20 + $0xd8] sm:$0xff] }
  0x60   : > { %774 = vst [vmem:[%s1424_s22 + $0xa0] sm:$0xff] %v710_v16  ;;  %v648_v29 = vmul.f32 %v1053_v22, %v392_v11  ;;  %1070 = vpow2.f32 %v560_v19  ;;  %v566_v31 = vmul.f32 1.442695, %v468_v20  ;;  %v469_v32 = vmul.f32 0.5, %v341_v14  ;;  %v398_v61 = vld [vmem:[%s1393_s8 + $0xe0] sm:$0xff]  ;;  %v399_v62 = vld [vmem:[%s1393_s8 + $0xe8] sm:$0xff] }
  0x61   : > { %v711_v35 = vadd.f32 %v647_v23, %v263_v17  ;;  %v649_v36 = vmul.f32 %v1055_v28, %v393_v18  ;;  %1072 = vpow2.f32 %v562_v26  ;;  %v470_v38 = vmul.f32 0.5, %v342_v21  ;;  %v348_v6 = vld [vmem:[%s1370_s11 + $0x150] sm:$0xff]  ;;  %v270_v10 = vld [vmem:[%s1400_s20 + $0xe0] sm:$0xff]  ;;  %v349_v13 = vld [vmem:[%s1370_s11 + $0x158] sm:$0xff] }
  0x62   : > { %v712_v41 = vadd.f32 %v648_v29, %v264_v24  ;;  %v650_v42 = vmul.f32 %v1057_v34, %v394_v25  ;;  %1074 = vpow2.f32 %v564_v27  ;;  %v568_v44 = vmul.f32 1.442695, %v469_v32  ;;  %v400_v11 = vld [vmem:[%s1393_s8 + $0xf0] sm:$0xff]  ;;  %v271_v17 = vld [vmem:[%s1400_s20 + $0xe8] sm:$0xff]  ;;  %v401_v18 = vld [vmem:[%s1393_s8 + $0xf8] sm:$0xff] }
  0x63   : > { %775 = vst [vmem:[%s1424_s22 + $0xa8] sm:$0xff] %v711_v35  ;;  %v713_v46 = vadd.f32 %v649_v36, %v265_v30  ;;  %1076 = vpow2.f32 %v566_v31  ;;  %v570_v48 = vmul.f32 1.442695, %v470_v38  ;;  %v471_v49 = vmul.f32 0.5, %v343_v33  ;;  %v1059_v51 = vpop.eup %1058  ;;  %v272_v23 = vld [vmem:[%s1400_s20 + $0xf0] sm:$0xff]  ;;  %v402_v24 = vld [vmem:[%s1393_s8 + $0x100] sm:$0xff] }
  0x64   : > { %776 = vst [vmem:[%s1424_s22 + $0xb0] sm:$0xff] %v712_v41  ;;  %v714_v52 = vadd.f32 %v650_v42, %v266_v37  ;;  %1078 = vpow2.f32 %v568_v44  ;;  %v472_v56 = vmul.f32 0.5, %v344_v39  ;;  %v473_v57 = vmul.f32 0.5, %v345_v40  ;;  %v350_v26 = vld [vmem:[%s1370_s11 + $0x160] sm:$0xff]  ;;  %v273_v30 = vld [vmem:[%s1400_s20 + $0xf8] sm:$0xff]  ;;  %v403_v31 = vld [vmem:[%s1393_s8 + $0x108] sm:$0xff] }
  0x65   : > { %v1061_v58 = vpop.eup %1060  ;;  %777 = vst [vmem:[%s1424_s22 + $0xb8] sm:$0xff] %v713_v46  ;;  %v651_v59 = vmul.f32 %v1059_v51, %v395_v43  ;;  %1080 = vpow2.f32 %v570_v48  ;;  %v572_v63 = vmul.f32 1.442695, %v471_v49  ;;  %v474_v0 = vmul.f32 0.5, %v346_v45  ;;  %v351_v33 = vld [vmem:[%s1370_s11 + $0x168] sm:$0xff]  ;;  %v274_v37 = vld [vmem:[%s1400_s20 + $0x100] sm:$0xff] }
  0x66   : > { %v1063_v1 = vpop.eup %1062  ;;  %778 = vst [vmem:[%s1424_s22 + $0xc0] sm:$0xff] %v714_v52  ;;  %v652_v2 = vmul.f32 %v1061_v58, %v396_v47  ;;  %v574_v3 = vmul.f32 1.442695, %v472_v56  ;;  %v576_v4 = vmul.f32 1.442695, %v473_v57  ;;  %v475_v5 = vmul.f32 0.5, %v347_v50 }
  0x67   : > { %v1065_v7 = vpop.eup %1064  ;;  %v715_v8 = vadd.f32 %v651_v59, %v267_v53  ;;  %v653_v9 = vmul.f32 %v1063_v1, %v397_v55  ;;  %1082 = vpow2.f32 %v572_v63  ;;  %v578_v12 = vmul.f32 1.442695, %v474_v0  ;;  %v404_v38 = vld [vmem:[%s1393_s8 + $0x110] sm:$0xff]  ;;  %v275_v43 = vld [vmem:[%s1400_s20 + $0x108] sm:$0xff]  ;;  %v405_v44 = vld [vmem:[%s1393_s8 + $0x118] sm:$0xff] }
  0x68   : > { %v1067_v14 = vpop.eup %1066  ;;  %v716_v15 = vadd.f32 %v652_v2, %v268_v54  ;;  %v654_v16 = vmul.f32 %v1065_v7, %v398_v61  ;;  %1084 = vpow2.f32 %v574_v3  ;;  %v580_v19 = vmul.f32 1.442695, %v475_v5  ;;  %v352_v47 = vld [vmem:[%s1370_s11 + $0x170] sm:$0xff]  ;;  %v406_v52 = vld [vmem:[%s1393_s8 + $0x120] sm:$0xff]  ;;  %v353_v54 = vld [vmem:[%s1370_s11 + $0x178] sm:$0xff] }
  0x69   : > { %v1069_v20 = vpop.eup %1068  ;;  %779 = vst [vmem:[%s1424_s22 + $0xc8] sm:$0xff] %v715_v8  ;;  %v717_v21 = vadd.f32 %v653_v9, %v269_v60  ;;  %v655_v22 = vmul.f32 %v1067_v14, %v399_v62  ;;  %1086 = vpow2.f32 %v576_v4  ;;  %v476_v25 = vmul.f32 0.5, %v348_v6  ;;  %v276_v51 = vld [vmem:[%s1400_s20 + $0x110] sm:$0xff]  ;;  %v277_v58 = vld [vmem:[%s1400_s20 + $0x118] sm:$0xff]  ;;  %v354_v60 = vld [vmem:[%s1370_s11 + $0x180] sm:$0xff] }
  0x6a   : > { %v1071_v27 = vpop.eup %1070  ;;  %780 = vst [vmem:[%s1424_s22 + $0xd0] sm:$0xff] %v716_v15  ;;  %v718_v28 = vadd.f32 %v654_v16, %v270_v10  ;;  %v656_v29 = vmul.f32 %v1069_v20, %v400_v11  ;;  %1088 = vpow2.f32 %v578_v12  ;;  %v477_v32 = vmul.f32 0.5, %v349_v13  ;;  %v278_v0 = vld [vmem:[%s1400_s20 + $0x120] sm:$0xff]  ;;  %v407_v1 = vld [vmem:[%s1393_s8 + $0x128] sm:$0xff]  ;;  %v408_v7 = vld [vmem:[%s1393_s8 + $0x130] sm:$0xff] }
  0x6b   : > { %v1073_v34 = vpop.eup %1072  ;;  %781 = vst [vmem:[%s1424_s22 + $0xd8] sm:$0xff] %v717_v21  ;;  %v719_v35 = vadd.f32 %v655_v22, %v271_v17  ;;  %v657_v36 = vmul.f32 %v1071_v27, %v401_v18  ;;  %1090 = vpow2.f32 %v580_v19  ;;  %v582_v39 = vmul.f32 1.442695, %v476_v25  ;;  %v355_v4 = vld [vmem:[%s1370_s11 + $0x188] sm:$0xff]  ;;  %v356_v9 = vld [vmem:[%s1370_s11 + $0x190] sm:$0xff]  ;;  %v409_v13 = vld [vmem:[%s1393_s8 + $0x138] sm:$0xff] }
  0x6c   : > { %v1075_v40 = vpop.eup %1074  ;;  %782 = vst [vmem:[%s1424_s22 + $0xe0] sm:$0xff] %v718_v28  ;;  %v720_v41 = vadd.f32 %v656_v29, %v272_v23  ;;  %v658_v42 = vmul.f32 %v1073_v34, %v402_v24  ;;  %v584_v45 = vmul.f32 1.442695, %v477_v32  ;;  %v478_v46 = vmul.f32 0.5, %v350_v26  ;;  %v279_v12 = vld [vmem:[%s1400_s20 + $0x128] sm:$0xff]  ;;  %v280_v19 = vld [vmem:[%s1400_s20 + $0x130] sm:$0xff] }
  0x6d   : > { %v1077_v48 = vpop.eup %1076  ;;  %783 = vst [vmem:[%s1424_s22 + $0xe8] sm:$0xff] %v719_v35  ;;  %v721_v49 = vadd.f32 %v657_v36, %v273_v30  ;;  %v659_v50 = vmul.f32 %v1075_v40, %v403_v31  ;;  %1092 = vpow2.f32 %v582_v39  ;;  %v479_v53 = vmul.f32 0.5, %v351_v33  ;;  %v410_v20 = vld [vmem:[%s1393_s8 + $0x140] sm:$0xff]  ;;  %v281_v25 = vld [vmem:[%s1400_s20 + $0x138] sm:$0xff]  ;;  %v411_v26 = vld [vmem:[%s1393_s8 + $0x148] sm:$0xff] }
  0x6e   : > { %v1079_v55 = vpop.eup %1078  ;;  %784 = vst [vmem:[%s1424_s22 + $0xf0] sm:$0xff] %v720_v41  ;;  %v722_v56 = vadd.f32 %v658_v42, %v274_v37  ;;  %v660_v57 = vmul.f32 %v1077_v48, %v404_v38  ;;  %1094 = vpow2.f32 %v584_v45  ;;  %v586_v59 = vmul.f32 1.442695, %v478_v46  ;;  %v357_v29 = vld [vmem:[%s1370_s11 + $0x198] sm:$0xff]  ;;  %v282_v33 = vld [vmem:[%s1400_s20 + $0x140] sm:$0xff]  ;;  %v359_v36 = vld [vmem:[%s1370_s11 + $0x1a8] sm:$0xff] }
  0x6f   : > { %v1081_v61 = vpop.eup %1080  ;;  %785 = vst [vmem:[%s1424_s22 + $0xf8] sm:$0xff] %v721_v49  ;;  %v723_v62 = vadd.f32 %v659_v50, %v275_v43  ;;  %v661_v63 = vmul.f32 %v1079_v55, %v405_v44  ;;  %v588_v2 = vmul.f32 1.442695, %v479_v53  ;;  %v480_v3 = vmul.f32 0.5, %v352_v47  ;;  %v358_v35 = vld [vmem:[%s1370_s11 + $0x1a0] sm:$0xff]  ;;  %v283_v40 = vld [vmem:[%s1400_s20 + $0x148] sm:$0xff] }
  0x70   : > { %786 = vst [vmem:[%s1424_s22 + $0x100] sm:$0xff] %v722_v56  ;;  %v724_v5 = vadd.f32 %v660_v57, %v276_v51  ;;  %v662_v6 = vmul.f32 %v1081_v61, %v406_v52  ;;  %1096 = vpow2.f32 %v586_v59  ;;  %v481_v8 = vmul.f32 0.5, %v353_v54  ;;  %v412_v41 = vld [vmem:[%s1393_s8 + $0x150] sm:$0xff]  ;;  %v413_v46 = vld [vmem:[%s1393_s8 + $0x158] sm:$0xff]  ;;  %v362_v54 = vld [vmem:[%s1370_s11 + $0x1c0] sm:$0xff] }
  0x71   : > { %v1083_v10 = vpop.eup %1082  ;;  %787 = vst [vmem:[%s1424_s22 + $0x108] sm:$0xff] %v723_v62  ;;  %v725_v11 = vadd.f32 %v661_v63, %v277_v58  ;;  %1098 = vpow2.f32 %v588_v2  ;;  %v590_v14 = vmul.f32 1.442695, %v480_v3  ;;  %v482_v15 = vmul.f32 0.5, %v354_v60  ;;  %v360_v43 = vld [vmem:[%s1370_s11 + $0x1b0] sm:$0xff]  ;;  %v361_v48 = vld [vmem:[%s1370_s11 + $0x1b8] sm:$0xff] }
  0x72   : > { %v1085_v16 = vpop.eup %1084  ;;  %788 = vst [vmem:[%s1424_s22 + $0x110] sm:$0xff] %v724_v5  ;;  %v726_v17 = vadd.f32 %v662_v6, %v278_v0  ;;  %v663_v18 = vmul.f32 %v1083_v10, %v407_v1  ;;  %v592_v21 = vmul.f32 1.442695, %v481_v8  ;;  %v483_v22 = vmul.f32 0.5, %v355_v4  ;;  %v284_v51 = vld [vmem:[%s1400_s20 + $0x150] sm:$0xff]  ;;  %v285_v58 = vld [vmem:[%s1400_s20 + $0x158] sm:$0xff] }
  0x73   : > { %v1087_v23 = vpop.eup %1086  ;;  %789 = vst [vmem:[%s1424_s22 + $0x118] sm:$0xff] %v725_v11  ;;  %v664_v24 = vmul.f32 %v1085_v16, %v408_v7  ;;  %1100 = vpow2.f32 %v590_v14  ;;  %v594_v27 = vmul.f32 1.442695, %v482_v15  ;;  %v484_v28 = vmul.f32 0.5, %v356_v9  ;;  %v414_v59 = vld [vmem:[%s1393_s8 + $0x160] sm:$0xff]  ;;  %v415_v60 = vld [vmem:[%s1393_s8 + $0x168] sm:$0xff] }
  0x74   : > { %v1089_v30 = vpop.eup %1088  ;;  %790 = vst [vmem:[%s1424_s22 + $0x120] sm:$0xff] %v726_v17  ;;  %v727_v31 = vadd.f32 %v663_v18, %v279_v12  ;;  %v665_v32 = vmul.f32 %v1087_v23, %v409_v13  ;;  %1102 = vpow2.f32 %v592_v21  ;;  %v596_v34 = vmul.f32 1.442695, %v483_v22  ;;  %v363_v3 = vld [vmem:[%s1370_s11 + $0x1c8] sm:$0xff]  ;;  %v286_v6 = vld [vmem:[%s1400_s20 + $0x160] sm:$0xff]  ;;  %v364_v9 = vld [vmem:[%s1370_s11 + $0x1d0] sm:$0xff] }
  0x75   : > { %v1091_v37 = vpop.eup %1090  ;;  %v728_v38 = vadd.f32 %v664_v24, %v280_v19  ;;  %v666_v39 = vmul.f32 %v1089_v30, %v410_v20  ;;  %1104 = vpow2.f32 %v594_v27  ;;  %v598_v42 = vmul.f32 1.442695, %v484_v28  ;;  %v365_v10 = vld [vmem:[%s1370_s11 + $0x1d8] sm:$0xff]  ;;  %v287_v14 = vld [vmem:[%s1400_s20 + $0x168] sm:$0xff]  ;;  %v416_v15 = vld [vmem:[%s1393_s8 + $0x170] sm:$0xff] }
  0x76   : > { %791 = vst [vmem:[%s1424_s22 + $0x128] sm:$0xff] %v727_v31  ;;  %v729_v44 = vadd.f32 %v665_v32, %v281_v25  ;;  %v667_v45 = vmul.f32 %v1091_v37, %v411_v26  ;;  %1106 = vpow2.f32 %v596_v34  ;;  %v485_v47 = vmul.f32 0.5, %v357_v29  ;;  %v417_v18 = vld [vmem:[%s1393_s8 + $0x178] sm:$0xff]  ;;  %v288_v23 = vld [vmem:[%s1400_s20 + $0x170] sm:$0xff]  ;;  %v418_v24 = vld [vmem:[%s1393_s8 + $0x180] sm:$0xff] }
  0x77   : > { %v1093_v49 = vpop.eup %1092  ;;  %792 = vst [vmem:[%s1424_s22 + $0x130] sm:$0xff] %v728_v38  ;;  %v730_v50 = vadd.f32 %v666_v39, %v282_v33  ;;  %1108 = vpow2.f32 %v598_v42  ;;  %v486_v52 = vmul.f32 0.5, %v358_v35  ;;  %v487_v53 = vmul.f32 0.5, %v359_v36  ;;  %v366_v27 = vld [vmem:[%s1370_s11 + $0x1e0] sm:$0xff]  ;;  %v289_v31 = vld [vmem:[%s1400_s20 + $0x178] sm:$0xff]  ;;  %v419_v32 = vld [vmem:[%s1393_s8 + $0x188] sm:$0xff] }
  0x78   : > { %v1095_v55 = vpop.eup %1094  ;;  %793 = vst [vmem:[%s1424_s22 + $0x138] sm:$0xff] %v729_v44  ;;  %v731_v56 = vadd.f32 %v667_v45, %v283_v40  ;;  %v668_v57 = vmul.f32 %v1093_v49, %v412_v41  ;;  %v600_v61 = vmul.f32 1.442695, %v485_v47  ;;  %v488_v62 = vmul.f32 0.5, %v360_v43  ;;  %v367_v34 = vld [vmem:[%s1370_s11 + $0x1e8] sm:$0xff]  ;;  %v290_v37 = vld [vmem:[%s1400_s20 + $0x180] sm:$0xff] }
  0x79   : > { %794 = vst [vmem:[%s1424_s22 + $0x140] sm:$0xff] %v730_v50  ;;  %v669_v63 = vmul.f32 %v1095_v55, %v413_v46  ;;  %v602_v0 = vmul.f32 1.442695, %v486_v52  ;;  %v604_v1 = vmul.f32 1.442695, %v487_v53  ;;  %v489_v2 = vmul.f32 0.5, %v361_v48 }
  0x7a   : > { %v1097_v4 = vpop.eup %1096  ;;  %795 = vst [vmem:[%s1424_s22 + $0x148] sm:$0xff] %v731_v56  ;;  %v732_v5 = vadd.f32 %v668_v57, %v284_v51  ;;  %1110 = vpow2.f32 %v600_v61  ;;  %v606_v7 = vmul.f32 1.442695, %v488_v62  ;;  %v490_v8 = vmul.f32 0.5, %v362_v54  ;;  %v420_v38 = vld [vmem:[%s1393_s8 + $0x190] sm:$0xff]  ;;  %v291_v44 = vld [vmem:[%s1400_s20 + $0x188] sm:$0xff] }
  0x7b   : > { %v1099_v11 = vpop.eup %1098  ;;  %v733_v12 = vadd.f32 %v669_v63, %v285_v58  ;;  %v670_v13 = vmul.f32 %v1097_v4, %v414_v59  ;;  %1112 = vpow2.f32 %v602_v0  ;;  %v608_v16 = vmul.f32 1.442695, %v489_v2  ;;  %v368_v46 = vld [vmem:[%s1370_s11 + $0x1f0] sm:$0xff]  ;;  %v369_v47 = vld [vmem:[%s1370_s11 + $0x1f8] sm:$0xff]  ;;  %v422_v58 = vld [vmem:[%s1393_s8 + $0x1a0] sm:$0xff]  ;;  %s1170_s11 = sshll.u32 %s1237_s10, 4  ;;  %s1171_s11 = int_to_ptr.vmem [resolvable:$false] %s1170_s11 }
  0x7c   : > { %796 = vst [vmem:[%s1424_s22 + $0x150] sm:$0xff] %v732_v5  ;;  %v671_v17 = vmul.f32 %v1099_v11, %v415_v60  ;;  %1114 = vpow2.f32 %v604_v1  ;;  %v610_v19 = vmul.f32 1.442695, %v490_v8  ;;  %v491_v20 = vmul.f32 0.5, %v363_v3  ;;  %v292_v51 = vld [vmem:[%s1400_s20 + $0x190] sm:$0xff]  ;;  %v421_v55 = vld [vmem:[%s1393_s8 + $0x198] sm:$0xff]  ;;  %p1173_p10 = scmp.lt.s32.totalorder %s1655_s27, %s1171_s11 }
  0x7d   : > { %v1101_v21 = vpop.eup %1100  ;;  %797 = vst [vmem:[%s1424_s22 + $0x158] sm:$0xff] %v733_v12  ;;  %v734_v22 = vadd.f32 %v670_v13, %v286_v6  ;;  %1116 = vpow2.f32 %v606_v7  ;;  %v492_v25 = vmul.f32 0.5, %v364_v9  ;;  %v493_v26 = vmul.f32 0.5, %v365_v10  ;;  %v293_v0 = vld [vmem:[%s1400_s20 + $0x198] sm:$0xff]  ;;  %v423_v1 = vld [vmem:[%s1393_s8 + $0x1a8] sm:$0xff]  ;;  %v294_v4 = vld [vmem:[%s1400_s20 + $0x1a0] sm:$0xff] }
  0x7e   : > { %v1103_v28 = vpop.eup %1102  ;;  %v735_v29 = vadd.f32 %v671_v17, %v287_v14  ;;  %v672_v30 = vmul.f32 %v1101_v21, %v416_v15  ;;  %1118 = vpow2.f32 %v608_v16  ;;  %v612_v33 = vmul.f32 1.442695, %v491_v20  ;;  %v424_v5 = vld [vmem:[%s1393_s8 + $0x1b0] sm:$0xff]  ;;  %v295_v10 = vld [vmem:[%s1400_s20 + $0x1a8] sm:$0xff]  ;;  %v425_v11 = vld [vmem:[%s1393_s8 + $0x1b8] sm:$0xff]  ;;  %s1172_s4 = scalar_lea.vmem %s1171_s11, 16384 }
  0x7f   : > { %v1105_v35 = vpop.eup %1104  ;;  %798 = vst [vmem:[%s1424_s22 + $0x160] sm:$0xff] %v734_v22  ;;  %v673_v36 = vmul.f32 %v1103_v28, %v417_v18  ;;  %1120 = vpow2.f32 %v610_v19  ;;  %v614_v39 = vmul.f32 1.442695, %v492_v25  ;;  %v616_v40 = vmul.f32 1.442695, %v493_v26  ;;  %v296_v15 = vld [vmem:[%s1400_s20 + $0x1b0] sm:$0xff]  ;;  %p1174_p0 = scmp.lt.s32.totalorder %s1172_s4, %s1166_s9 }
  0x80   : > { %v1107_v41 = vpop.eup %1106  ;;  %799 = vst [vmem:[%s1424_s22 + $0x168] sm:$0xff] %v735_v29  ;;  %v736_v42 = vadd.f32 %v672_v30, %v288_v23  ;;  %v674_v43 = vmul.f32 %v1105_v35, %v418_v24  ;;  %1122 = vpow2.f32 %v612_v33  ;;  %v494_v45 = vmul.f32 0.5, %v366_v27  ;;  %v426_v16 = vld [vmem:[%s1393_s8 + $0x1c0] sm:$0xff]  ;;  %v297_v20 = vld [vmem:[%s1400_s20 + $0x1b8] sm:$0xff]  ;;  %v427_v21 = vld [vmem:[%s1393_s8 + $0x1c8] sm:$0xff] }
  0x81   : > { %v1109_v48 = vpop.eup %1108  ;;  %v737_v49 = vadd.f32 %v673_v36, %v289_v31  ;;  %v675_v50 = vmul.f32 %v1107_v41, %v419_v32  ;;  %1124 = vpow2.f32 %v614_v39  ;;  %v495_v52 = vmul.f32 0.5, %v367_v34  ;;  %v298_v25 = vld [vmem:[%s1400_s20 + $0x1c0] sm:$0xff]  ;;  %v428_v26 = vld [vmem:[%s1393_s8 + $0x1d0] sm:$0xff]  ;;  %v299_v30 = vld [vmem:[%s1400_s20 + $0x1c8] sm:$0xff]  ;;  %p1175_p2 = por %p1174_p0, %p1173_p10 }
  0x82   : > { %800 = vst [vmem:[%s1424_s22 + $0x170] sm:$0xff] %v736_v42  ;;  %v738_v53 = vadd.f32 %v674_v43, %v290_v37  ;;  %v676_v54 = vmul.f32 %v1109_v48, %v420_v38  ;;  %1126 = vpow2.f32 %v616_v40  ;;  %v618_v56 = vmul.f32 1.442695, %v494_v45  ;;  %v429_v31 = vld [vmem:[%s1393_s8 + $0x1d8] sm:$0xff]  ;;  %v300_v35 = vld [vmem:[%s1400_s20 + $0x1d0] sm:$0xff]  ;;  %v430_v40 = vld [vmem:[%s1393_s8 + $0x1e0] sm:$0xff] }
  0x83   : > { %801 = vst [vmem:[%s1424_s22 + $0x178] sm:$0xff] %v737_v49  ;;  %v739_v57 = vadd.f32 %v675_v50, %v291_v44  ;;  %v620_v59 = vmul.f32 1.442695, %v495_v52  ;;  %v496_v60 = vmul.f32 0.5, %v368_v46  ;;  %v497_v61 = vmul.f32 0.5, %v369_v47  ;;  %v301_v39 = vld [vmem:[%s1400_s20 + $0x1d8] sm:$0xff]  ;;  %p1176_p4 = pnand %p1175_p2, %p1169_p8 }
  0x84   : > { %v1111_v62 = vpop.eup %1110  ;;  %802 = vst [vmem:[%s1424_s22 + $0x180] sm:$0xff] %v738_v53  ;;  %v740_v63 = vadd.f32 %v676_v54, %v292_v51  ;;  %1128 = vpow2.f32 %v618_v56  ;;  %v431_v43 = vld [vmem:[%s1393_s8 + $0x1e8] sm:$0xff]  ;;  %v302_v46 = vld [vmem:[%s1400_s20 + $0x1e0] sm:$0xff]  ;;  %v432_v51 = vld [vmem:[%s1393_s8 + $0x1f0] sm:$0xff] }
  0x85   : > { %v1113_v2 = vpop.eup %1112  ;;  %803 = vst [vmem:[%s1424_s22 + $0x188] sm:$0xff] %v739_v57  ;;  %v677_v3 = vmul.f32 %v1111_v62, %v421_v55  ;;  %1130 = vpow2.f32 %v620_v59  ;;  %v622_v6 = vmul.f32 1.442695, %v496_v60  ;;  %v624_v7 = vmul.f32 1.442695, %v497_v61  ;;  %v303_v50 = vld [vmem:[%s1400_s20 + $0x1e8] sm:$0xff] }
  0x86   : > { %v1115_v8 = vpop.eup %1114  ;;  %804 = vst [vmem:[%s1424_s22 + $0x190] sm:$0xff] %v740_v63  ;;  %v678_v9 = vmul.f32 %v1113_v2, %v422_v58  ;;  %v433_v53 = vld [vmem:[%s1393_s8 + $0x1f8] sm:$0xff]  ;;  %v304_v56 = vld [vmem:[%s1400_s20 + $0x1f0] sm:$0xff] }
  0x87   : > { %v1117_v12 = vpop.eup %1116  ;;  %v741_v13 = vadd.f32 %v677_v3, %v293_v0  ;;  %v679_v14 = vmul.f32 %v1115_v8, %v423_v1  ;;  %1132 = vpow2.f32 %v622_v6  ;;  %v305_v60 = vld [vmem:[%s1400_s20 + $0x1f8] sm:$0xff] }
  0x88   : > { %v1119_v17 = vpop.eup %1118  ;;  %v742_v18 = vadd.f32 %v678_v9, %v294_v4  ;;  %v680_v19 = vmul.f32 %v1117_v12, %v424_v5  ;;  %1134 = vpow2.f32 %v624_v7 }
  0x89   : > { %v1121_v22 = vpop.eup %1120  ;;  %805 = vst [vmem:[%s1424_s22 + $0x198] sm:$0xff] %v741_v13  ;;  %v743_v23 = vadd.f32 %v679_v14, %v295_v10  ;;  %v681_v24 = vmul.f32 %v1119_v17, %v425_v11 }
  0x8a   : > { %v1123_v27 = vpop.eup %1122  ;;  %806 = vst [vmem:[%s1424_s22 + $0x1a0] sm:$0xff] %v742_v18  ;;  %v744_v28 = vadd.f32 %v680_v19, %v296_v15  ;;  %v682_v29 = vmul.f32 %v1121_v22, %v426_v16 }
  0x8b   : > { %v1125_v32 = vpop.eup %1124  ;;  %807 = vst [vmem:[%s1424_s22 + $0x1a8] sm:$0xff] %v743_v23  ;;  %v745_v33 = vadd.f32 %v681_v24, %v297_v20  ;;  %v683_v34 = vmul.f32 %v1123_v27, %v427_v21 }
  0x8c   : > { %v1127_v36 = vpop.eup %1126  ;;  %808 = vst [vmem:[%s1424_s22 + $0x1b0] sm:$0xff] %v744_v28  ;;  %v746_v37 = vadd.f32 %v682_v29, %v298_v25  ;;  %v684_v38 = vmul.f32 %v1125_v32, %v428_v26 }
  0x8d   : > { %809 = vst [vmem:[%s1424_s22 + $0x1b8] sm:$0xff] %v745_v33  ;;  %v747_v41 = vadd.f32 %v683_v34, %v299_v30  ;;  %v685_v42 = vmul.f32 %v1127_v36, %v429_v31 }
  0x8e   : > { %v1129_v44 = vpop.eup %1128  ;;  %810 = vst [vmem:[%s1424_s22 + $0x1c0] sm:$0xff] %v746_v37  ;;  %v748_v45 = vadd.f32 %v684_v38, %v300_v35 }
  0x8f   : > { %v1131_v47 = vpop.eup %1130  ;;  %811 = vst [vmem:[%s1424_s22 + $0x1c8] sm:$0xff] %v747_v41  ;;  %v749_v48 = vadd.f32 %v685_v42, %v301_v39  ;;  %v686_v49 = vmul.f32 %v1129_v44, %v430_v40 }
  0x90   : > { %812 = vst [vmem:[%s1424_s22 + $0x1d0] sm:$0xff] %v748_v45  ;;  %v687_v52 = vmul.f32 %v1131_v47, %v431_v43 }
  0x91   : > { %v1133_v54 = vpop.eup %1132  ;;  %813 = vst [vmem:[%s1424_s22 + $0x1d8] sm:$0xff] %v749_v48  ;;  %v750_v55 = vadd.f32 %v686_v49, %v302_v46 }
  0x92   : > { %v1135_v57 = vpop.eup %1134  ;;  %v751_v58 = vadd.f32 %v687_v52, %v303_v50  ;;  %v688_v59 = vmul.f32 %v1133_v54, %v432_v51 }
  0x93   : > { %814 = vst [vmem:[%s1424_s22 + $0x1e0] sm:$0xff] %v750_v55  ;;  %v689_v61 = vmul.f32 %v1135_v57, %v433_v53 }
  0x94   : > { %815 = vst [vmem:[%s1424_s22 + $0x1e8] sm:$0xff] %v751_v58  ;;  %v752_v62 = vadd.f32 %v688_v59, %v304_v56 }
  0x95   : > { %v753_v63 = vadd.f32 %v689_v61, %v305_v60 }
  0x96   : > { %816 = vst [vmem:[%s1424_s22 + $0x1f0] sm:$0xff] %v752_v62 }
  0x97   : > { %817 = vst [vmem:[%s1424_s22 + $0x1f8] sm:$0xff] %v753_v63 }
  0x98   : > { %1179 = shalt.err (!%p1176_p4)
}
  0x99   : > { %s1180_s23 = scalar_lea.hbm %s1653_s30, 8192  ;;  %s1184_s8 = scalar_lea.hbm %s1704_s3, 16384 }
  0x9a   : > { %p1181_p5 = scmp.ne.s32.totalorder %s1653_s30, %s1180_s23  ;;  %p1185_p1 = scmp.lt.u32.totalorder %s1653_s30, %s1704_s3 }
  0x9b   : > { %p1186_p3 = scmp.lt.u32.totalorder %s1184_s8, %s1180_s23  ;;  %p1188_p6 = scmp.lt.u32.totalorder %s1180_s23, %s1653_s30 }
  0x9c   : > { %p1182_p7 = pnand %p1181_p5, %p1711_p12 }
  0x9d   : > { %p1187_p11 = por %p1186_p3, %p1185_p1 }
  0x9e   : > { %p1183_p9 = pneg %p1182_p7 }
  0x9f   : > { %p1189_p13 = por %p1188_p6, %p1187_p11 }
  0xa1   : > { %p1190_p8 = pnand %p1189_p13, %p1183_p9 }
  0xa3   : > { %1193 = shalt.err (!%p1190_p8)
}
  0xa4   : > { %s1238_s20 = smov 512   ;;  %s1239_s22 = smov 32  }
  0xa5   : > { %960 = dma.vmem_to_hbm [thread:$0]  (%p1711_p12), %s1655_s27, 8192, %s1653_s30, %s819_s16, %s1238_s20, %s1238_s20, %s1239_s22  }
  0xa6 PF: > { %s848_s26 = sand.u32 1, %s1220_s12   ;;  %p1712_p10 = scmp.ne.s32.totalorder %s1709_s25, 0 }
  0xa7   : > { %p1713_p0 = scmp.ge.s32.totalorder %s1232_s15, 2  ;;  %s849_s28 = scalar_lea.sflag [#allocation4], %s848_s26 }
  0xa9   : > { %p967_p2 = pnand %p1713_p0, %p1712_p10 }
  0xab   : > { %1215 = dma.done.wait (!%p967_p2), %s849_s28, 8192  }
  0xac   : > { %1217 = vsyncadd (!%p967_p2), %s849_s28, 4294959104  ;;  %p16_p4 = scmp.ge.s32.totalorder %s1285_s18, 4   ;;  %s1714_s12 = smov %s1224_s13 }
  0xad   : > { %s1715_s13 = smov %s1228_s14  ;;  %s1716_s14 = smov %s1297_s21 }
  0xae   : > { %s1717_s15 = smov %s1285_s18  ;;  %18 = sbr.rel (!%p16_p4) target bundleno = 5 (0x5), region = 83 }
  0xb5   :  { %854 = vsyncpa [#allocation3], 1 }
  0xb6   :  { %856 = vsyncpa [#allocation3 + $0x1], 1 }
  0xb7   :  { %857 = vsyncpa [#allocation4], 1 }
  0xb8   :  { %859 = vsyncpa [#allocation4 + $0x1], 1 }

</bundles_post_ra>
